<compile_context>
chip_gen: v7x
topology: tpu7x:2x2x1
jax: 0.10.0
libtpu: 0.0.40
codegen_flags: <defaults>
</compile_context>

<pallas_src>
import functools

import jax
import jax.numpy as jnp
from jax.experimental import pallas as pl
from jax.experimental.pallas import tpu as pltpu

LANE = 128      # lane width of a vreg
SUBLANE = 8     # f32 sublane count


def _round_up(n, m):
    return ((n + m - 1) // m) * m


def _pinned_spec(shape):
    """Full-array block pinned resident across the batch grid axis.

    The index_map is constant, so double-buffering parameters is pure VMEM
    waste; Buffered(1) halves their footprint (matters on v7x's 64 MiB VMEM if
    the hidden width / depth is ever scaled up). Falls back gracefully on jax
    versions without pipeline_mode.
    """
    index_map = lambda i: (0, 0)
    try:
        return pl.BlockSpec(shape, index_map, pipeline_mode=pl.Buffered(1))
    except (AttributeError, TypeError, ValueError):
        return pl.BlockSpec(shape, index_map)


# ---------------------------------------------------------------------------
# Fused MLP kernel: x @ W0 + b0 -> ReLU -> ... -> x @ Wlast + blast
# refs = (x_ref, w0, b0, w1, b1, ..., wN, bN, o_ref)
# ---------------------------------------------------------------------------
def _fused_mlp_kernel(*refs, n_layers: int, compute_dtype):
    x_ref = refs[0]
    o_ref = refs[-1]
    layer_refs = refs[1:-1]

    # In-kernel f32 -> bf16 cast (VPU work, hidden under the HBM-bound x DMA).
    h = x_ref[...].astype(compute_dtype)             # [TM, K]
    for li in range(n_layers):
        w = layer_refs[2 * li][...]                  # bf16 [Kin, Np]
        b = layer_refs[2 * li + 1][...]              # f32  [1, Np]
        y = jnp.dot(h, w, preferred_element_type=jnp.float32) + b
        if li < n_layers - 1:
            h = jnp.maximum(y, 0.0).astype(compute_dtype)  # ReLU, back to bf16
        else:
            o_ref[...] = y.astype(o_ref.dtype)       # last layer: no ReLU


# ---------------------------------------------------------------------------
# Parameter packing.
#  * Weights stored [in_features, out_features] (transpose of PyTorch), bf16.
#  * Out-feature dims padded to 128 lanes (NOT 256 — HBM-bound, see header).
#  * First layer keeps the raw num_in rows (x is not feature-padded); hidden
#    layers' in-dims are padded to the previous layer's padded width with zero
#    rows (padded activation columns are exactly zero, so results are exact).
#  * Biases stored as [1, Np] f32 (broadcast in-kernel; no replication DMA).
# ---------------------------------------------------------------------------
def pack_params(params, compute_dtype=jnp.bfloat16):
    packed = []
    prev_out_p = None
    for idx, (w, b) in enumerate(params):
        K, N = w.shape
        Kp = K if idx == 0 else prev_out_p
        Np = _round_up(N, LANE)
        wp = jnp.zeros((Kp, Np), compute_dtype).at[:K, :N].set(w.astype(compute_dtype))
        bp = jnp.zeros((1, Np), jnp.float32).at[:, :N].set(
            b.astype(jnp.float32)[None, :])
        packed.append((wp, bp))
        prev_out_p = Np
    return packed


def fused_mlp_forward(x2d, packed_params, out_features):
    """x2d: [B, K] f32 -> logits [B, out_features] f32, one pallas_call."""
    B, K = x2d.shape
    assert packed_params[0][0].shape[0] == K, "first layer in_features mismatch"
    Np_last = packed_params[-1][0].shape[1]
    n_layers = len(packed_params)
    compute_dtype = packed_params[0][0].dtype

    param_bytes = sum(int(w.size) * w.dtype.itemsize + int(b.size) * b.dtype.itemsize
                      for w, b in packed_params)

    def vmem_need(tm):
        return (2 * tm * K * 4            # double-buffered f32 x tile
                + 2 * tm * Np_last * 4    # double-buffered f32 out tile
                + 2 * param_bytes         # params (x2 in case Buffered(1) unsupported)
                + (4 << 20))              # headroom for compiler scratch

    # Batch tile: >=512 reaches ~85% of HBM roofline (vs ~63% at 256); per-step
    # pipeline overhead (~0.35us) dominates at small tiles. Capped by a VMEM
    # budget that stays comfortably inside v7x's 64 MiB physical VMEM (and
    # bounds register-spill pressure from the live f32 pre-ReLU activation).
    VMEM_BUDGET = 40 << 20
    TM = min(B, 1024)
    while TM > SUBLANE and vmem_need(TM) > VMEM_BUDGET:
        TM = max(SUBLANE, TM // 2)
    # TODO(synk): if param_bytes alone approaches the budget (very wide/deep
    # configs, esp. on v7x), tile the feature dim with a second grid axis and
    # a scratch accumulator instead of keeping all weights resident.

    if TM >= B:
        # Single full-array block: legal for any B (block == full array dims),
        # no batch padding and no extra XLA pad op around the call.
        TM = B
        Mp = B
    else:
        TM = max(SUBLANE, (TM // SUBLANE) * SUBLANE)   # sublane-aligned tile
        Mp = _round_up(B, TM)

    xp = x2d if Mp == B else jnp.pad(x2d, ((0, Mp - B), (0, 0)))

    in_specs = [pl.BlockSpec((TM, K), lambda i: (i, 0))]
    inputs = [xp]
    for w, b in packed_params:
        in_specs.append(_pinned_spec(w.shape))
        in_specs.append(_pinned_spec(b.shape))
        inputs.extend([w, b])

    # v5e's default scoped VMEM is only 16 MiB; raise the limit so the large
    # double-buffered x tile isn't forced into a smaller tiling. (Harmless on
    # v6e/v7x; capped well under physical VMEM.)
    vmem_limit = int(min(max(32 << 20, vmem_need(TM)), 64 << 20))

    out = pl.pallas_call(
        functools.partial(_fused_mlp_kernel, n_layers=n_layers,
                          compute_dtype=compute_dtype),
        out_shape=jax.ShapeDtypeStruct((Mp, Np_last), jnp.float32),
        grid=(Mp // TM,),
        in_specs=in_specs,
        out_specs=pl.BlockSpec((TM, Np_last), lambda i: (i, 0)),
        compiler_params=pltpu.CompilerParams(
            dimension_semantics=("parallel",),
            vmem_limit_bytes=vmem_limit),
    )(*inputs)
    return out[:B, :out_features]


# ---------------------------------------------------------------------------
# Model glue
# ---------------------------------------------------------------------------
def init_params(key, num_in, num_out, num_layers, output_num):
    """Deterministic init mirroring the module's layer shapes.

    Weights are stored [in_features, out_features].
    """
    dims = [(num_in, num_out)] + [(num_out, num_out)] * num_layers + [(num_out, output_num)]
    params = []
    for fan_in, fan_out in dims:
        key, kw, kb = jax.random.split(key, 3)
        bound = 1.0 / jnp.sqrt(jnp.float32(fan_in))
        w = jax.random.uniform(kw, (fan_in, fan_out), jnp.float32, -bound, bound)
        b = jax.random.uniform(kb, (fan_out,), jnp.float32, -bound, bound)
        params.append((w, b))
    return params


def baseline_dropout_model_forward(X, packed_params, output_num):
    """X: [B, C, H, W] -> logits [B, output_num]."""
    B = X.shape[0]
    x = X.reshape(B, -1)  # nn.Flatten()
    return fused_mlp_forward(x, packed_params, output_num)


if __name__ == "__main__":
    # Small shapes: X = [2, 4, 16, 16] -> num_in = 4*16*16 = 1024
    B, C, H, W = 2, 4, 16, 16
    num_in = C * H * W
    num_out = 32
    num_layers = 2
    output_num = 8

    key = jax.random.PRNGKey(0)
    key, kx = jax.random.split(key)
    X = jax.random.normal(kx, (B, C, H, W), jnp.float32)

    params = init_params(key, num_in, num_out, num_layers, output_num)
    packed = pack_params(params, compute_dtype=jnp.bfloat16)

    logits = baseline_dropout_model_forward(X, packed, output_num)
    logits = jax.block_until_ready(logits)

    # Reference in plain JAX with the same bf16-operand / f32-accumulate math.
    # (NOTE: deliberate bf16 MXU-operand trade vs. the f32 PyTorch module.)
    x_ref = X.reshape(B, -1)
    n = len(params)
    for i, (w, b) in enumerate(params):
        y = jnp.dot(x_ref.astype(jnp.bfloat16), w.astype(jnp.bfloat16),
                    preferred_element_type=jnp.float32) + b
        x_ref = jnp.maximum(y, 0.0) if i < n - 1 else y

    assert logits.shape == (B, output_num), logits.shape
    assert jnp.allclose(logits, x_ref, atol=2e-3, rtol=2e-3), (
        jnp.max(jnp.abs(logits - x_ref)))

    print("KERNEL_OK")
</pallas_src>

<mosaic_0001>
module attributes {stable_mosaic.version = 11 : i64} {
  func.func @_fused_mlp_kernel(%arg0: i32, %arg1: memref<2x1024xf32, #tpu.memory_space<vmem>>, %arg2: memref<1024x128xbf16, #tpu.memory_space<vmem>>, %arg3: memref<1x128xf32, #tpu.memory_space<vmem>>, %arg4: memref<128x128xbf16, #tpu.memory_space<vmem>>, %arg5: memref<1x128xf32, #tpu.memory_space<vmem>>, %arg6: memref<128x128xbf16, #tpu.memory_space<vmem>>, %arg7: memref<1x128xf32, #tpu.memory_space<vmem>>, %arg8: memref<128x128xbf16, #tpu.memory_space<vmem>>, %arg9: memref<1x128xf32, #tpu.memory_space<vmem>>, %arg10: memref<2x128xf32, #tpu.memory_space<vmem>>) attributes {dimension_semantics = [#tpu.dimension_semantics<parallel>], iteration_bounds = array<i64: 1>, scalar_prefetch = 0 : i64, scratch_operands = 0 : i64, tpu.core_type = #tpu.core_type<tc>, window_params = [{transform_indices = @transform_0, window_bounds = array<i64: 2, 1024>}, {pipeline_mode = #tpu.pipeline_mode<synchronous>, transform_indices = @transform_1, window_bounds = array<i64: 1024, 128>}, {pipeline_mode = #tpu.pipeline_mode<synchronous>, transform_indices = @transform_2, window_bounds = array<i64: 1, 128>}, {pipeline_mode = #tpu.pipeline_mode<synchronous>, transform_indices = @transform_3, window_bounds = array<i64: 128, 128>}, {pipeline_mode = #tpu.pipeline_mode<synchronous>, transform_indices = @transform_4, window_bounds = array<i64: 1, 128>}, {pipeline_mode = #tpu.pipeline_mode<synchronous>, transform_indices = @transform_5, window_bounds = array<i64: 128, 128>}, {pipeline_mode = #tpu.pipeline_mode<synchronous>, transform_indices = @transform_6, window_bounds = array<i64: 1, 128>}, {pipeline_mode = #tpu.pipeline_mode<synchronous>, transform_indices = @transform_7, window_bounds = array<i64: 128, 128>}, {pipeline_mode = #tpu.pipeline_mode<synchronous>, transform_indices = @transform_8, window_bounds = array<i64: 1, 128>}, {transform_indices = @transform_9, window_bounds = array<i64: 2, 128>}]} {
    %c0 = arith.constant 0 : index
    %c0_0 = arith.constant 0 : index
    %0 = vector.load %arg1[%c0, %c0_0] : memref<2x1024xf32, #tpu.memory_space<vmem>>, vector<2x1024xf32>
    %1 = arith.truncf %0 : vector<2x1024xf32> to vector<2x1024xbf16>
    %c0_1 = arith.constant 0 : index
    %c0_2 = arith.constant 0 : index
    %2 = vector.load %arg2[%c0_1, %c0_2] : memref<1024x128xbf16, #tpu.memory_space<vmem>>, vector<1024x128xbf16>
    %c0_3 = arith.constant 0 : index
    %c0_4 = arith.constant 0 : index
    %3 = vector.load %arg3[%c0_3, %c0_4] : memref<1x128xf32, #tpu.memory_space<vmem>>, vector<1x128xf32>
    %cst = arith.constant dense<0.000000e+00> : vector<2x128xf32>
    %4 = tpu.matmul %1, %2, %cst {dimension_numbers = #tpu.dot_dimension_numbers<[1], [0], [0], [1], [0, 0, 1, 1], [], []>} : vector<2x1024xbf16>, vector<1024x128xbf16>, vector<2x128xf32> -> vector<2x128xf32>
    %5 = vector.broadcast %3 : vector<1x128xf32> to vector<2x128xf32>
    %6 = arith.addf %4, %5 : vector<2x128xf32>
    %cst_5 = arith.constant 0.000000e+00 : f32
    %7 = vector.broadcast %cst_5 : f32 to vector<2x128xf32>
    %8 = arith.maximumf %6, %7 : vector<2x128xf32>
    %9 = arith.truncf %8 : vector<2x128xf32> to vector<2x128xbf16>
    %c0_6 = arith.constant 0 : index
    %c0_7 = arith.constant 0 : index
    %10 = vector.load %arg4[%c0_6, %c0_7] : memref<128x128xbf16, #tpu.memory_space<vmem>>, vector<128x128xbf16>
    %c0_8 = arith.constant 0 : index
    %c0_9 = arith.constant 0 : index
    %11 = vector.load %arg5[%c0_8, %c0_9] : memref<1x128xf32, #tpu.memory_space<vmem>>, vector<1x128xf32>
    %cst_10 = arith.constant dense<0.000000e+00> : vector<2x128xf32>
    %12 = tpu.matmul %9, %10, %cst_10 {dimension_numbers = #tpu.dot_dimension_numbers<[1], [0], [0], [1], [0, 0, 1, 1], [], []>} : vector<2x128xbf16>, vector<128x128xbf16>, vector<2x128xf32> -> vector<2x128xf32>
    %13 = vector.broadcast %11 : vector<1x128xf32> to vector<2x128xf32>
    %14 = arith.addf %12, %13 : vector<2x128xf32>
    %cst_11 = arith.constant 0.000000e+00 : f32
    %15 = vector.broadcast %cst_11 : f32 to vector<2x128xf32>
    %16 = arith.maximumf %14, %15 : vector<2x128xf32>
    %17 = arith.truncf %16 : vector<2x128xf32> to vector<2x128xbf16>
    %c0_12 = arith.constant 0 : index
    %c0_13 = arith.constant 0 : index
    %18 = vector.load %arg6[%c0_12, %c0_13] : memref<128x128xbf16, #tpu.memory_space<vmem>>, vector<128x128xbf16>
    %c0_14 = arith.constant 0 : index
    %c0_15 = arith.constant 0 : index
    %19 = vector.load %arg7[%c0_14, %c0_15] : memref<1x128xf32, #tpu.memory_space<vmem>>, vector<1x128xf32>
    %cst_16 = arith.constant dense<0.000000e+00> : vector<2x128xf32>
    %20 = tpu.matmul %17, %18, %cst_16 {dimension_numbers = #tpu.dot_dimension_numbers<[1], [0], [0], [1], [0, 0, 1, 1], [], []>} : vector<2x128xbf16>, vector<128x128xbf16>, vector<2x128xf32> -> vector<2x128xf32>
    %21 = vector.broadcast %19 : vector<1x128xf32> to vector<2x128xf32>
    %22 = arith.addf %20, %21 : vector<2x128xf32>
    %cst_17 = arith.constant 0.000000e+00 : f32
    %23 = vector.broadcast %cst_17 : f32 to vector<2x128xf32>
    %24 = arith.maximumf %22, %23 : vector<2x128xf32>
    %25 = arith.truncf %24 : vector<2x128xf32> to vector<2x128xbf16>
    %c0_18 = arith.constant 0 : index
    %c0_19 = arith.constant 0 : index
    %26 = vector.load %arg8[%c0_18, %c0_19] : memref<128x128xbf16, #tpu.memory_space<vmem>>, vector<128x128xbf16>
    %c0_20 = arith.constant 0 : index
    %c0_21 = arith.constant 0 : index
    %27 = vector.load %arg9[%c0_20, %c0_21] : memref<1x128xf32, #tpu.memory_space<vmem>>, vector<1x128xf32>
    %cst_22 = arith.constant dense<0.000000e+00> : vector<2x128xf32>
    %28 = tpu.matmul %25, %26, %cst_22 {dimension_numbers = #tpu.dot_dimension_numbers<[1], [0], [0], [1], [0, 0, 1, 1], [], []>} : vector<2x128xbf16>, vector<128x128xbf16>, vector<2x128xf32> -> vector<2x128xf32>
    %29 = vector.broadcast %27 : vector<1x128xf32> to vector<2x128xf32>
    %30 = arith.addf %28, %29 : vector<2x128xf32>
    %c0_23 = arith.constant 0 : index
    %c0_24 = arith.constant 0 : index
    %31 = vector.load %arg10[%c0_23, %c0_24] : memref<2x128xf32, #tpu.memory_space<vmem>>, vector<2x128xf32>
    tpu.vector_store %arg10[%c0_23, %c0_24], %30 {strides = array<i32>} : memref<2x128xf32, #tpu.memory_space<vmem>>, vector<2x128xf32>,
    return
  }
  func.func @transform_0(%arg0: i32) -> (i32, i32) {
    %c0_i32 = arith.constant 0 : i32
    %c0_i32_0 = arith.constant 0 : i32
    return %arg0, %c0_i32 : i32, i32
  }
  func.func @transform_1(%arg0: i32) -> (i32, i32) {
    %c0_i32 = arith.constant 0 : i32
    %c0_i32_0 = arith.constant 0 : i32
    %c0_i32_1 = arith.constant 0 : i32
    return %c0_i32, %c0_i32_0 : i32, i32
  }
  func.func @transform_2(%arg0: i32) -> (i32, i32) {
    %c0_i32 = arith.constant 0 : i32
    %c0_i32_0 = arith.constant 0 : i32
    %c0_i32_1 = arith.constant 0 : i32
    return %c0_i32, %c0_i32_0 : i32, i32
  }
  func.func @transform_3(%arg0: i32) -> (i32, i32) {
    %c0_i32 = arith.constant 0 : i32
    %c0_i32_0 = arith.constant 0 : i32
    %c0_i32_1 = arith.constant 0 : i32
    return %c0_i32, %c0_i32_0 : i32, i32
  }
  func.func @transform_4(%arg0: i32) -> (i32, i32) {
    %c0_i32 = arith.constant 0 : i32
    %c0_i32_0 = arith.constant 0 : i32
    %c0_i32_1 = arith.constant 0 : i32
    return %c0_i32, %c0_i32_0 : i32, i32
  }
  func.func @transform_5(%arg0: i32) -> (i32, i32) {
    %c0_i32 = arith.constant 0 : i32
    %c0_i32_0 = arith.constant 0 : i32
    %c0_i32_1 = arith.constant 0 : i32
    return %c0_i32, %c0_i32_0 : i32, i32
  }
  func.func @transform_6(%arg0: i32) -> (i32, i32) {
    %c0_i32 = arith.constant 0 : i32
    %c0_i32_0 = arith.constant 0 : i32
    %c0_i32_1 = arith.constant 0 : i32
    return %c0_i32, %c0_i32_0 : i32, i32
  }
  func.func @transform_7(%arg0: i32) -> (i32, i32) {
    %c0_i32 = arith.constant 0 : i32
    %c0_i32_0 = arith.constant 0 : i32
    %c0_i32_1 = arith.constant 0 : i32
    return %c0_i32, %c0_i32_0 : i32, i32
  }
  func.func @transform_8(%arg0: i32) -> (i32, i32) {
    %c0_i32 = arith.constant 0 : i32
    %c0_i32_0 = arith.constant 0 : i32
    %c0_i32_1 = arith.constant 0 : i32
    return %c0_i32, %c0_i32_0 : i32, i32
  }
  func.func @transform_9(%arg0: i32) -> (i32, i32) {
    %c0_i32 = arith.constant 0 : i32
    %c0_i32_0 = arith.constant 0 : i32
    return %arg0, %c0_i32 : i32, i32
  }
}

</mosaic_0001>

<bundles_post_ra>
// kernel: tpu_custom_call.1
= control target key start
LH: loop header
LB: loop body
LE: loop exit
PB: predicated region body
PF: predicated region fallthrough
CT: control target
= control target key end

     0   :  { %14 = vsyncpa [#allocation3], 0  ;;  %s1891_s0 = inlined_call_operand.hbm [shape: f32[2,1024], index: 0, kind: input, shape index: {}]   ;;  %s1892_s1 = inlined_call_operand.hbm [shape: bf16[1024,128], index: 1, kind: input, shape index: {}]   ;;  %s1893_s2 = inlined_call_operand.vmem [shape: f32[1,128], index: 2, kind: input, shape index: {}]   ;;  %s1894_s3 = inlined_call_operand.hbm [shape: bf16[128,128], index: 3, kind: input, shape index: {}]   ;;  %s1895_s4 = inlined_call_operand.vmem [shape: f32[1,128], index: 4, kind: input, shape index: {}]   ;;  %s1896_s5 = inlined_call_operand.hbm [shape: bf16[128,128], index: 5, kind: input, shape index: {}]   ;;  %s1897_s6 = inlined_call_operand.vmem [shape: f32[1,128], index: 6, kind: input, shape index: {}]   ;;  %s1898_s7 = inlined_call_operand.hbm [shape: bf16[128,128], index: 7, kind: input, shape index: {}]   ;;  %s1899_s8 = inlined_call_operand.vmem [shape: f32[1,128], index: 8, kind: input, shape index: {}]   ;;  %s1900_s9 = inlined_call_operand.hbm [shape: f32[2,128], index: 9, kind: output, shape index: {}]  }
   0x1   :  { %15 = vsyncpa [#allocation6], 0 }
   0x2   :  { %16 = vsyncpa [#allocation9], 0 }
   0x3   :  { %17 = vsyncpa [#allocation4], 0  ;;  %s1698_s30 = smov [#allocation5]   ;;  %s1558_s13 = scalar_lea.hbm %s1892_s1, 8192 }
   0x4   :  { %s33_s10 = sshll.u32 %s1698_s30, 4  ;;  %p1559_p0 = scmp.ne.s32.totalorder %s1892_s1, %s1558_s13  ;;  %s34_s10 = int_to_ptr.vmem [resolvable:$true] %s33_s10 }
   0x5   :  { %p1562_p1 = scmp.lt.u32.totalorder %s1558_s13, %s1892_s1 }
   0x7   :  { %p1564_p2 = pnand %p1562_p1, %p1559_p0 }
   0x9   :  { %1567 = shalt.err (!%p1564_p2)
}
   0xa   :  { %s1568_s18 = scalar_lea.vmem %s34_s10, 8192  ;;  %p1573_p4 = scmp.lt.s32.totalorder %s34_s10, %s34_s10 }
   0xb   :  { %p1569_p3 = scmp.ne.s32.totalorder %s34_s10, %s1568_s18  ;;  %p1574_p5 = scmp.lt.s32.totalorder %s1568_s18, %s1568_s18 }
   0xd   :  { %p1575_p6 = por %p1574_p5, %p1573_p4 }
   0xf   :  { %p1576_p7 = pnand %p1575_p6, %p1569_p3 }
  0x11   :  { %1579 = shalt.err (!%p1576_p7)
}
  0x12   :  { %s1699_s19 = smov 64   ;;  %s1700_s20 = smov 4  }
  0x13   :  { %39 = dma.hbm_to_vmem [thread:$0]  %s1892_s1, 8192, %s34_s10, [#allocation6], %s1699_s19, %s1699_s19, %s1700_s20  }
  0x14   :  { %s1701_s23 = smov [#allocation8]   ;;  %s1702_s25 = smov [#allocation2]  }
  0x15   :  { %s61_s24 = sshll.u32 %s1701_s23, 4  ;;  %s24_s26 = sshll.u32 %s1702_s25, 4  ;;  %s62_s24 = int_to_ptr.vmem [resolvable:$true] %s61_s24  ;;  %s25_s26 = int_to_ptr.vmem [resolvable:$true] %s24_s26 }
  0x16   :  { %s1580_s29 = scalar_lea.hbm %s1896_s5, 1024 }
  0x17   :  { %p1581_p8 = scmp.ne.s32.totalorder %s1896_s5, %s1580_s29  ;;  %p1584_p9 = scmp.lt.u32.totalorder %s1580_s29, %s1896_s5 }
  0x19   :  { %p1586_p10 = pnand %p1584_p9, %p1581_p8 }
  0x1b   :  { %1589 = shalt.err (!%p1586_p10)
}
  0x1c   :  { %s1590_s1 = scalar_lea.vmem %s62_s24, 1024  ;;  %p1595_p12 = scmp.lt.s32.totalorder %s62_s24, %s62_s24 }
  0x1d   :  { %p1591_p11 = scmp.ne.s32.totalorder %s62_s24, %s1590_s1  ;;  %p1596_p13 = scmp.lt.s32.totalorder %s1590_s1, %s1590_s1 }
  0x1f   :  { %p1597_p0 = por %p1596_p13, %p1595_p12 }
  0x21   :  { %p1598_p1 = pnand %p1597_p0, %p1591_p11 }
  0x23   :  { %1601 = shalt.err (!%p1598_p1)
}
  0x24   :  { %67 = dma.hbm_to_vmem [thread:$0]  %s1896_s5, 1024, %s62_s24, [#allocation9], %s1699_s19, %s1699_s19, %s1700_s20  }
  0x25   :  { %s1602_s17 = scalar_lea.hbm %s1891_s0, 256 }
  0x26   :  { %p1603_p2 = scmp.ne.s32.totalorder %s1891_s0, %s1602_s17  ;;  %p1606_p3 = scmp.lt.u32.totalorder %s1602_s17, %s1891_s0 }
  0x28   :  { %p1608_p4 = pnand %p1606_p3, %p1603_p2 }
  0x2a   :  { %1611 = shalt.err (!%p1608_p4)
}
  0x2b   :  { %s1612_s25 = scalar_lea.vmem %s25_s26, 256  ;;  %p1617_p6 = scmp.lt.s32.totalorder %s25_s26, %s25_s26 }
  0x2c   :  { %p1613_p5 = scmp.ne.s32.totalorder %s25_s26, %s1612_s25  ;;  %p1618_p7 = scmp.lt.s32.totalorder %s1612_s25, %s1612_s25 }
  0x2e   :  { %p1619_p8 = por %p1618_p7, %p1617_p6 }
  0x30   :  { %p1620_p9 = pnand %p1619_p8, %p1613_p5 }
  0x32   :  { %1623 = shalt.err (!%p1620_p9)
}
  0x33   :  { %27 = dma.hbm_to_vmem [thread:$0]  %s1891_s0, 256, %s25_s26, [#allocation3]  }
  0x34   :  { %s1703_s27 = smov [#allocation7]   ;;  %s1704_s29 = smov [#allocation10]  }
  0x35   :  { %s47_s28 = sshll.u32 %s1703_s27, 4  ;;  %s75_s30 = sshll.u32 %s1704_s29, 4  ;;  %s48_s28 = int_to_ptr.vmem [resolvable:$true] %s47_s28  ;;  %s76_s30 = int_to_ptr.vmem [resolvable:$true] %s75_s30 }
  0x36   :  { %s1624_s13 = scalar_lea.hbm %s1894_s3, 1024 }
  0x37   :  { %p1625_p10 = scmp.ne.s32.totalorder %s1894_s3, %s1624_s13  ;;  %p1628_p11 = scmp.lt.u32.totalorder %s1624_s13, %s1894_s3 }
  0x39   :  { %p1630_p12 = pnand %p1628_p11, %p1625_p10 }
  0x3b   :  { %1633 = shalt.err (!%p1630_p12)
}
  0x3c   :  { %s1634_s0 = scalar_lea.vmem %s48_s28, 1024  ;;  %p1639_p0 = scmp.lt.s32.totalorder %s48_s28, %s48_s28 }
  0x3d   :  { %p1635_p13 = scmp.ne.s32.totalorder %s48_s28, %s1634_s0  ;;  %p1640_p1 = scmp.lt.s32.totalorder %s1634_s0, %s1634_s0 }
  0x3f   :  { %p1641_p2 = por %p1640_p1, %p1639_p0 }
  0x41   :  { %p1642_p3 = pnand %p1641_p2, %p1635_p13 }
  0x43   :  { %1645 = shalt.err (!%p1642_p3)
}
  0x44   :  { %53 = dma.hbm_to_vmem [thread:$0]  %s1894_s3, 1024, %s48_s28, [#allocation6], %s1699_s19, %s1699_s19, %s1700_s20  }
  0x45   :  { %s1646_s21 = scalar_lea.hbm %s1898_s7, 1024 }
  0x46   :  { %p1647_p4 = scmp.ne.s32.totalorder %s1898_s7, %s1646_s21  ;;  %p1650_p5 = scmp.lt.u32.totalorder %s1646_s21, %s1898_s7 }
  0x48   :  { %p1652_p6 = pnand %p1650_p5, %p1647_p4 }
  0x4a   :  { %1655 = shalt.err (!%p1652_p6)
}
  0x4b   :  { %s1656_s24 = scalar_lea.vmem %s76_s30, 1024  ;;  %p1661_p8 = scmp.lt.s32.totalorder %s76_s30, %s76_s30 }
  0x4c   :  { %p1657_p7 = scmp.ne.s32.totalorder %s76_s30, %s1656_s24  ;;  %p1662_p9 = scmp.lt.s32.totalorder %s1656_s24, %s1656_s24 }
  0x4e   :  { %p1663_p10 = por %p1662_p9, %p1661_p8 }
  0x50   :  { %p1664_p11 = pnand %p1663_p10, %p1657_p7 }
  0x52   :  { %1667 = shalt.err (!%p1664_p11)
}
  0x53   :  { %81 = dma.hbm_to_vmem [thread:$0]  %s1898_s7, 1024, %s76_s30, [#allocation9], %s1699_s19, %s1699_s19, %s1700_s20  }
  0x54   :  { %1690 = dma.done.wait [#allocation3], 256  }
  0x55   :  { %1691 = vsyncadd [#allocation3], 4294967040 }
  0x56   :  { %1692 = dma.done.wait [#allocation6], 9216  }
  0x57   :  { %1693 = vsyncadd [#allocation6], 4294958080 }
  0x58   :  { %1694 = dma.done.wait [#allocation9], 2048  }
  0x59   :  { %1695 = vsyncadd [#allocation9], 4294965248  ;;  %v1468_v0 = vld [vmem:[#allocation5 + $0x40] sm:$0xff]   ;;  %v1472_v4 = vld [vmem:[#allocation5 + $0x48] sm:$0xff]   ;;  %v1705_v22 = vmov 1983009808   ;;  %v108_v24 = vlaneseq }
  0x5a   :  { %v1469_v1 = vld [vmem:[#allocation5 + $0xc0] sm:$0xff]   ;;  %1282 = vmatprep.subr.bf16.mxu0 %v1468_v0  ;;  %v1473_v5 = vld [vmem:[#allocation5 + $0xc8] sm:$0xff]   ;;  %v1476_v8 = vld [vmem:[#allocation5 + $0x50] sm:$0xff]   ;;  %v106_v23 = vunpack.c.l.s4 %v1705_v22  ;;  %vm1707_vm0 = vmmov 0   ;;  %s1708_s11 = smov [#allocation11]  }
  0x5b   :  { %v1470_v2 = vld [vmem:[#allocation5] sm:$0xff]   ;;  %1304 = vmatprep.subr.bf16.mxu1 %v1469_v1  ;;  %v1474_v6 = vld [vmem:[#allocation5 + $0x8] sm:$0xff]   ;;  %v1477_v9 = vld [vmem:[#allocation5 + $0xd0] sm:$0xff]   ;;  %v109_v30 = vshrl.u32 %v108_v24, 7  ;;  %s1179_s12 = sshll.u32 %s1708_s11, 4  ;;  %s1180_s12 = int_to_ptr.vmem [resolvable:$true] %s1179_s12 }
  0x5c   :  { %v1471_v3 = vld [vmem:[#allocation5 + $0x80] sm:$0xff]   ;;  %1283 = vmatpush3.bf16.msra.mxu0 %v1470_v2  ;;  %v1475_v7 = vld [vmem:[#allocation5 + $0x88] sm:$0xff]   ;;  %v1478_v10 = vld [vmem:[#allocation5 + $0x10] sm:$0xff]   ;;  %v107_v29 = vunpack.c.0.s8 %v106_v23  ;;  %p1673_p13 = scmp.lt.s32.totalorder %s1180_s12, %s1180_s12 }
  0x5d   :  { %1305 = vmatpush3.bf16.msra.mxu1 %v1471_v3  ;;  %1284 = vmatprep.subr.bf16.mxu0 %v1472_v4  ;;  %v1479_v11 = vld [vmem:[#allocation5 + $0x90] sm:$0xff]   ;;  %v1480_v12 = vld [vmem:[#allocation5 + $0x58] sm:$0xff]   ;;  %v1484_v16 = vld [vmem:[#allocation5 + $0x60] sm:$0xff]  }
  0x5e   :  { %1306 = vmatprep.subr.bf16.mxu1 %v1473_v5  ;;  %v1481_v13 = vld [vmem:[#allocation5 + $0xd8] sm:$0xff]   ;;  %v1485_v17 = vld [vmem:[#allocation5 + $0xe0] sm:$0xff]   ;;  %v1488_v20 = vld [vmem:[#allocation5 + $0x68] sm:$0xff]   ;;  %v1831_v35 = vsub.s32 %v107_v29, %v109_v30 }
  0x5f   :  { %v1482_v14 = vld [vmem:[#allocation5 + $0x18] sm:$0xff]   ;;  %v1486_v18 = vld [vmem:[#allocation5 + $0x20] sm:$0xff]   ;;  %v1489_v21 = vld [vmem:[#allocation5 + $0xe8] sm:$0xff]  }
  0x60   :  { %1285 = vmatpush3.bf16.msra.mxu0 %v1474_v6  ;;  %v1483_v15 = vld [vmem:[#allocation5 + $0x98] sm:$0xff]   ;;  %v1487_v19 = vld [vmem:[#allocation5 + $0xa0] sm:$0xff]   ;;  %v1490_v25 = vld [vmem:[#allocation5 + $0x28] sm:$0xff]  }
  0x61   :  { %1307 = vmatpush3.bf16.msra.mxu1 %v1475_v7  ;;  %1286 = vmatprep.subr.bf16.mxu0 %v1476_v8  ;;  %v1491_v26 = vld [vmem:[#allocation5 + $0xa8] sm:$0xff]   ;;  %v1492_v27 = vld [vmem:[#allocation5 + $0x70] sm:$0xff]   ;;  %v1496_v33 = vld [vmem:[#allocation5 + $0x78] sm:$0xff]  }
  0x62   :  { %1308 = vmatprep.subr.bf16.mxu1 %v1477_v9  ;;  %v1493_v28 = vld [vmem:[#allocation5 + $0xf0] sm:$0xff]   ;;  %v1497_v34 = vld [vmem:[#allocation5 + $0xf8] sm:$0xff]   ;;  %v1501_v41 = vld [vmem:[#allocation5 + $0x140] sm:$0xff]  }
  0x63   :  { %v1494_v31 = vld [vmem:[#allocation5 + $0x30] sm:$0xff]   ;;  %v1498_v36 = vld [vmem:[#allocation5 + $0x38] sm:$0xff]   ;;  %v1502_v42 = vld [vmem:[#allocation5 + $0x1c0] sm:$0xff]  }
  0x64   :  { %1287 = vmatpush3.bf16.msra.mxu0 %v1478_v10  ;;  %v1495_v32 = vld [vmem:[#allocation5 + $0xb0] sm:$0xff]   ;;  %v1499_v37 = vld [vmem:[#allocation5 + $0xb8] sm:$0xff]   ;;  %v1503_v46 = vld [vmem:[#allocation5 + $0x100] sm:$0xff]  }
  0x65   :  { %1309 = vmatpush3.bf16.msra.mxu1 %v1479_v11  ;;  %1288 = vmatprep.subr.bf16.mxu0 %v1480_v12  ;;  %v100_v38 = vld [vmem:[#allocation2] sm:$0xff]  ;;  %v1504_v49 = vld [vmem:[#allocation5 + $0x180] sm:$0xff]   ;;  %v1505_v51 = vld [vmem:[#allocation5 + $0x148] sm:$0xff]  }
  0x66   :  { %1310 = vmatprep.subr.bf16.mxu1 %v1481_v13  ;;  %v111_v39 = vrot.slane %v100_v38, %v1831_v35  ;;  %v104_v40 = vcombine.high %v100_v38, %v100_v38  ;;  %v1506_v53 = vld [vmem:[#allocation5 + $0x1c8] sm:$0xff]   ;;  %v1509_v56 = vld [vmem:[#allocation5 + $0x150] sm:$0xff]   ;;  %v1513_v60 = vld [vmem:[#allocation5 + $0x158] sm:$0xff]  }
  0x67   :  { %v1507_v54 = vld [vmem:[#allocation5 + $0x108] sm:$0xff]   ;;  %v1510_v57 = vld [vmem:[#allocation5 + $0x1d0] sm:$0xff]   ;;  %v1514_v61 = vld [vmem:[#allocation5 + $0x1d8] sm:$0xff]  }
  0x68   :  { %1289 = vmatpush3.bf16.msra.mxu0 %v1482_v14  ;;  %v119_v43 = vcombine.high %v111_v39, %v111_v39  ;;  %v118_v44 = vrot.slane %v104_v40, %v1831_v35  ;;  %v146_v45 = vpack.c.bf16 %v111_v39, %v111_v39  ;;  %v1508_v55 = vld [vmem:[#allocation5 + $0x188] sm:$0xff]   ;;  %v1511_v58 = vld [vmem:[#allocation5 + $0x110] sm:$0xff]   ;;  %v1515_v62 = vld [vmem:[#allocation5 + $0x118] sm:$0xff]  }
  0x69   :  { %1311 = vmatpush3.bf16.msra.mxu1 %v1483_v15  ;;  %1290 = vmatprep.subr.bf16.mxu0 %v1484_v16  ;;  %v1512_v59 = vld [vmem:[#allocation5 + $0x190] sm:$0xff]   ;;  %v1516_v63 = vld [vmem:[#allocation5 + $0x198] sm:$0xff]   ;;  %v1517_v0 = vld [vmem:[#allocation5 + $0x160] sm:$0xff]  }
  0x6a   :  { %1312 = vmatprep.subr.bf16.mxu1 %v1485_v17  ;;  %v147_v47 = vpack.c.bf16 %v119_v43, %v119_v43  ;;  %v120_v48 = vcombine.high %v118_v44, %v118_v44  ;;  %v148_v50 = vpack.c.bf16 %v118_v44, %v118_v44  ;;  %v1518_v1 = vld [vmem:[#allocation5 + $0x1e0] sm:$0xff]   ;;  %v1521_v4 = vld [vmem:[#allocation5 + $0x168] sm:$0xff]   ;;  %v1525_v8 = vld [vmem:[#allocation5 + $0x170] sm:$0xff]  }
  0x6b   :  { %v1519_v2 = vld [vmem:[#allocation5 + $0x120] sm:$0xff]   ;;  %v1522_v5 = vld [vmem:[#allocation5 + $0x1e8] sm:$0xff]   ;;  %v1526_v9 = vld [vmem:[#allocation5 + $0x1f0] sm:$0xff]  }
  0x6c   :  { %1291 = vmatpush3.bf16.msra.mxu0 %v1486_v18  ;;  %705 = vmatprep.mubr.bf16.mxu0 %v147_v47  ;;  %v149_v52 = vpack.c.bf16 %v120_v48, %v120_v48  ;;  %v1520_v3 = vld [vmem:[#allocation5 + $0x1a0] sm:$0xff]   ;;  %v1523_v6 = vld [vmem:[#allocation5 + $0x128] sm:$0xff]   ;;  %v1527_v10 = vld [vmem:[#allocation5 + $0x130] sm:$0xff]  }
  0x6d   :  { %1313 = vmatpush3.bf16.msra.mxu1 %v1487_v19  ;;  %1292 = vmatprep.subr.bf16.mxu0 %v1488_v20  ;;  %v1524_v7 = vld [vmem:[#allocation5 + $0x1a8] sm:$0xff]   ;;  %v1528_v11 = vld [vmem:[#allocation5 + $0x1b0] sm:$0xff]   ;;  %v1529_v12 = vld [vmem:[#allocation5 + $0x178] sm:$0xff]  }
  0x6e   :  { %1314 = vmatprep.subr.bf16.mxu1 %v1489_v21  ;;  %745 = vmatprep.mubr.bf16.mxu1 %v149_v52  ;;  %v1530_v13 = vld [vmem:[#allocation5 + $0x1f8] sm:$0xff]   ;;  %v1536_v29 = vld [vmem:[#allocation7 + $0x10] sm:$0xff]   ;;  %v1546_v39 = vld [vmem:[#allocation8 + $0x20] sm:$0xff]  }
  0x6f   :  { %v1531_v14 = vld [vmem:[#allocation5 + $0x138] sm:$0xff]   ;;  %v1547_v40 = vld [vmem:[#allocation8 + $0x28] sm:$0xff]  }
  0x70   :  { %1293 = vmatpush3.bf16.msra.mxu0 %v1490_v25  ;;  %v101_v15 = vld [vmem:[#allocation2 + $0x8] sm:$0xff] }
  0x71   :  { %1315 = vmatpush3.bf16.msra.mxu1 %v1491_v26  ;;  %1294 = vmatprep.subr.bf16.mxu0 %v1492_v27  ;;  %v1532_v16 = vld [vmem:[#allocation5 + $0x1b8] sm:$0xff]   ;;  %v128_v17 = vrot.slane %v101_v15, %v1831_v35  ;;  %v121_v18 = vcombine.high %v101_v15, %v101_v15  ;;  %v1534_v26 = vld [vmem:[#allocation7] sm:$0xff]   ;;  %v1706_v27 = vmov 0.0  }
  0x72   :  { %1316 = vmatprep.subr.bf16.mxu1 %v1493_v28  ;;  %v1535_v28 = vld [vmem:[#allocation7 + $0x8] sm:$0xff]   ;;  %v1537_v30 = vld [vmem:[#allocation7 + $0x18] sm:$0xff]  }
  0x73   :  { %v136_v19 = vcombine.high %v128_v17, %v128_v17  ;;  %v135_v20 = vrot.slane %v121_v18, %v1831_v35  ;;  %v150_v21 = vpack.c.bf16 %v128_v17, %v128_v17  ;;  %v1542_v35 = vld [vmem:[#allocation8] sm:$0xff]   ;;  %v1545_v38 = vld [vmem:[#allocation8 + $0x18] sm:$0xff]  }
  0x74   :  { %1295 = vmatpush3.bf16.msra.mxu0 %v1494_v31  ;;  %v1538_v31 = vld [vmem:[#allocation7 + $0x20] sm:$0xff]  }
  0x75   :  { %1317 = vmatpush3.bf16.msra.mxu1 %v1495_v32  ;;  %1296 = vmatprep.subr.bf16.mxu0 %v1496_v33  ;;  %v151_v22 = vpack.c.bf16 %v136_v19, %v136_v19  ;;  %v137_v23 = vcombine.high %v135_v20, %v135_v20  ;;  %v152_v24 = vpack.c.bf16 %v135_v20, %v135_v20  ;;  %v1539_v32 = vld [vmem:[#allocation7 + $0x28] sm:$0xff]   ;;  %v1540_v33 = vld [vmem:[#allocation7 + $0x30] sm:$0xff]  }
  0x76   :  { %1318 = vmatprep.subr.bf16.mxu1 %v1497_v34  ;;  %v1541_v34 = vld [vmem:[#allocation7 + $0x38] sm:$0xff]   ;;  %v1556_v20 = vld [vmem:[#allocation10 + $0x30] sm:$0xff]  }
  0x77   :  { %v153_v25 = vpack.c.bf16 %v137_v23, %v137_v23 }
  0x78   :  { %1297 = vmatpush3.bf16.msra.mxu0 %v1498_v36  ;;  %v1543_v36 = vld [vmem:[#allocation8 + $0x8] sm:$0xff]  }
  0x79   :  { %1319 = vmatpush3.bf16.msra.mxu1 %v1499_v37  ;;  %1326 = vmatprep.subr.bf16.mxu0 %v1501_v41  ;;  %v1544_v37 = vld [vmem:[#allocation8 + $0x10] sm:$0xff]  }
  0x7a   :  { %1348 = vmatprep.subr.bf16.mxu1 %v1502_v42  ;;  %v1190_v42 = vld [vmem:[%s1893_s2] ss:$0 sm:$0xff] }
  0x7b   :  { %706 = vmatmul.mubr.bf16.vlgmr.msra.gmra.mrb[0].mxu0 %v146_v45 }
  0x7c   :  { %1327 = vmatpush3.bf16.msra.mxu0 %v1503_v46  ;;  %746 = vmatmul.mubr.bf16.vlgmr.msra.gmra.mrb[0].mxu1 %v148_v50 }
  0x7d   :  { %1328 = vmatprep.subr.bf16.mxu0 %v1505_v51  ;;  %1349 = vmatpush3.bf16.msra.mxu1 %v1504_v49 }
  0x7e   :  { %1350 = vmatprep.subr.bf16.mxu1 %v1506_v53  ;;  %785 = vmatprep.mubr.bf16.mxu0 %v151_v22  ;;  %v1264_v22 = vld [vmem:[%s1897_s6] ss:$0 sm:$0xff]  ;;  %s1668_s6 = scalar_lea.vmem %s1180_s12, 32 }
  0x7f   :  { %825 = vmatprep.mubr.bf16.mxu1 %v153_v25  ;;  %p1669_p12 = scmp.ne.s32.totalorder %s1180_s12, %s1668_s6  ;;  %p1674_p0 = scmp.lt.s32.totalorder %s1668_s6, %s1668_s6 }
  0x80   :  { %1329 = vmatpush3.bf16.msra.mxu0 %v1507_v54 }
  0x81   :  { %1330 = vmatprep.subr.bf16.mxu0 %v1509_v56  ;;  %1351 = vmatpush3.bf16.msra.mxu1 %v1508_v55  ;;  %p1675_p1 = por %p1674_p0, %p1673_p13 }
  0x82   :  { %1352 = vmatprep.subr.bf16.mxu1 %v1510_v57 }
  0x83   :  { %p1676_p2 = pnand %p1675_p1, %p1669_p12 }
  0x84   :  { %1331 = vmatpush3.bf16.msra.mxu0 %v1511_v58 }
  0x85   :  { %1332 = vmatprep.subr.bf16.mxu0 %v1513_v60  ;;  %1353 = vmatpush3.bf16.msra.mxu1 %v1512_v59 }
  0x86   :  { %1354 = vmatprep.subr.bf16.mxu1 %v1514_v61 }
  0x88   :  { %1333 = vmatpush3.bf16.msra.mxu0 %v1515_v62 }
  0x89   :  { %1334 = vmatprep.subr.bf16.mxu0 %v1517_v0  ;;  %1355 = vmatpush3.bf16.msra.mxu1 %v1516_v63 }
  0x8a   :  { %1356 = vmatprep.subr.bf16.mxu1 %v1518_v1 }
  0x8c   :  { %1335 = vmatpush3.bf16.msra.mxu0 %v1519_v2 }
  0x8d   :  { %1336 = vmatprep.subr.bf16.mxu0 %v1521_v4  ;;  %1357 = vmatpush3.bf16.msra.mxu1 %v1520_v3  ;;  %v1548_v4 = vld [vmem:[#allocation8 + $0x30] sm:$0xff]  }
  0x8e   :  { %1358 = vmatprep.subr.bf16.mxu1 %v1522_v5  ;;  %v1549_v5 = vld [vmem:[#allocation8 + $0x38] sm:$0xff]  }
  0x90   :  { %1337 = vmatpush3.bf16.msra.mxu0 %v1523_v6  ;;  %v1550_v6 = vld [vmem:[#allocation10] sm:$0xff]  }
  0x91   :  { %1338 = vmatprep.subr.bf16.mxu0 %v1525_v8  ;;  %1359 = vmatpush3.bf16.msra.mxu1 %v1524_v7  ;;  %v1551_v7 = vld [vmem:[#allocation10 + $0x8] sm:$0xff]   ;;  %v1552_v8 = vld [vmem:[#allocation10 + $0x10] sm:$0xff]  }
  0x92   :  { %1360 = vmatprep.subr.bf16.mxu1 %v1526_v9  ;;  %v1553_v9 = vld [vmem:[#allocation10 + $0x18] sm:$0xff]  }
  0x94   :  { %1339 = vmatpush3.bf16.msra.mxu0 %v1527_v10  ;;  %v1554_v10 = vld [vmem:[#allocation10 + $0x20] sm:$0xff]  }
  0x95   :  { %1340 = vmatprep.subr.bf16.mxu0 %v1529_v12  ;;  %1361 = vmatpush3.bf16.msra.mxu1 %v1528_v11  ;;  %v1555_v11 = vld [vmem:[#allocation10 + $0x28] sm:$0xff]   ;;  %v1255_v12 = vld [vmem:[%s1895_s4] ss:$0 sm:$0xff] }
  0x96   :  { %1362 = vmatprep.subr.bf16.mxu1 %v1530_v13 }
  0x98   :  { %1341 = vmatpush3.bf16.msra.mxu0 %v1531_v14 }
  0x99   :  { %1363 = vmatpush3.bf16.msra.mxu1 %v1532_v16  ;;  %1397 = vmatprep.subr.bf16.mxu0 %v1706_v27 }
  0x9a   :  { %1417 = vmatprep.subr.bf16.mxu1 %v1706_v27 }
  0x9b   :  { %786 = vmatmul.mubr.bf16.vlgmr.msra.gmra.mrb[4].mxu0 %v150_v21  ;;  %v1557_v21 = vld [vmem:[#allocation10 + $0x38] sm:$0xff]  }
  0x9c   :  { %826 = vmatmul.mubr.bf16.vlgmr.msra.gmra.mrb[4].mxu1 %v152_v24  ;;  %1398 = vmatpush3.bf16.msra.mxu0 %v1534_v26 }
  0x9d   :  { %1399 = vmatprep.subr.bf16.mxu0 %v1706_v27  ;;  %1413 = vmatprep.mubr.msk.bf16.mxu0 %vm1707_vm0, %v1706_v27 }
  0x9e   :  { %1433 = vmatprep.mubr.msk.bf16.mxu1 %vm1707_vm0, %v1706_v27  ;;  %1418 = vmatpush3.bf16.msra.mxu1 %v1542_v35 }
  0x9f   :  { %1419 = vmatprep.subr.bf16.mxu1 %v1706_v27 }
  0xa0   :  { %1400 = vmatpush3.bf16.msra.mxu0 %v1535_v28 }
  0xa1   :  { %1401 = vmatprep.subr.bf16.mxu0 %v1706_v27 }
  0xa2   :  { %1420 = vmatpush3.bf16.msra.mxu1 %v1543_v36 }
  0xa3   :  { %1421 = vmatprep.subr.bf16.mxu1 %v1706_v27 }
  0xa4   :  { %1402 = vmatpush3.bf16.msra.mxu0 %v1536_v29 }
  0xa5   :  { %1403 = vmatprep.subr.bf16.mxu0 %v1706_v27 }
  0xa6   :  { %1422 = vmatpush3.bf16.msra.mxu1 %v1544_v37 }
  0xa7   :  { %1423 = vmatprep.subr.bf16.mxu1 %v1706_v27 }
  0xa8   :  { %1404 = vmatpush3.bf16.msra.mxu0 %v1537_v30 }
  0xa9   :  { %1405 = vmatprep.subr.bf16.mxu0 %v1706_v27 }
  0xaa   :  { %1424 = vmatpush3.bf16.msra.mxu1 %v1545_v38 }
  0xab   :  { %1425 = vmatprep.subr.bf16.mxu1 %v1706_v27 }
  0xac   :  { %1406 = vmatpush3.bf16.msra.mxu0 %v1538_v31  ;;  %v1273_v31 = vld [vmem:[%s1899_s8] ss:$0 sm:$0xff] }
  0xad   :  { %1407 = vmatprep.subr.bf16.mxu0 %v1706_v27 }
  0xae   :  { %1426 = vmatpush3.bf16.msra.mxu1 %v1546_v39 }
  0xaf   :  { %1427 = vmatprep.subr.bf16.mxu1 %v1706_v27 }
  0xb0   :  { %1408 = vmatpush3.bf16.msra.mxu0 %v1539_v32 }
  0xb1   :  { %1409 = vmatprep.subr.bf16.mxu0 %v1706_v27 }
  0xb2   :  { %1428 = vmatpush3.bf16.msra.mxu1 %v1547_v40 }
  0xb3   :  { %1429 = vmatprep.subr.bf16.mxu1 %v1706_v27 }
  0xb4   :  { %1410 = vmatpush3.bf16.msra.mxu0 %v1540_v33 }
  0xb5   :  { %1411 = vmatprep.subr.bf16.mxu0 %v1706_v27 }
  0xb6   :  { %1430 = vmatpush3.bf16.msra.mxu1 %v1548_v4 }
  0xb7   :  { %1431 = vmatprep.subr.bf16.mxu1 %v1706_v27 }
  0xb8   :  { %1412 = vmatpush3.bf16.msra.mxu0 %v1541_v34 }
  0xb9   :  { %1437 = vmatprep.subr.bf16.mxu0 %v1706_v27 }
  0xba   :  { %1432 = vmatpush3.bf16.msra.mxu1 %v1549_v5 }
 0x14e   :  { %v1298_v41 = vpop.f32.mrb[0].mxu0 }
 0x14f   :  { %v1299_v43 = vpop.f32.mrb[1].mxu0  ;;  %v1320_v44 = vpop.f32.mrb[0].mxu1 }
 0x150   :  { %v1300_v45 = vadd.f32 %v1299_v43, %v1298_v41  ;;  %v1301_v46 = vpop.f32.mrb[2].mxu0  ;;  %v1321_v47 = vpop.f32.mrb[1].mxu1 }
 0x151   :  { %v1302_v48 = vpop.f32.mrb[3].mxu0  ;;  %v1322_v50 = vadd.f32 %v1321_v47, %v1320_v44  ;;  %v1323_v51 = vpop.f32.mrb[2].mxu1 }
 0x152   :  { %v708_v49 = vadd.f32 %v1300_v45, %v1190_v42  ;;  %v1324_v52 = vpop.f32.mrb[3].mxu1 }
 0x154   :  { %v748_v53 = vadd.f32 %v1322_v50, %v708_v49 }
 0x16e   :  { %v1342_v54 = vpop.f32.mrb[4].mxu0 }
 0x16f   :  { %v1343_v55 = vpop.f32.mrb[5].mxu0  ;;  %v1364_v56 = vpop.f32.mrb[4].mxu1 }
 0x170   :  { %v1344_v57 = vadd.f32 %v1343_v55, %v1342_v54  ;;  %v1345_v58 = vpop.f32.mrb[6].mxu0  ;;  %v1365_v59 = vpop.f32.mrb[5].mxu1 }
 0x171   :  { %v1346_v60 = vpop.f32.mrb[7].mxu0  ;;  %v1366_v62 = vadd.f32 %v1365_v59, %v1364_v56  ;;  %v1367_v63 = vpop.f32.mrb[6].mxu1 }
 0x172   :  { %v788_v61 = vadd.f32 %v1344_v57, %v748_v53  ;;  %v1368_v0 = vpop.f32.mrb[7].mxu1 }
 0x174   :  { %v828_v1 = vadd.f32 %v1366_v62, %v788_v61 }
 0x176   :  { %v833_v2 = vmax.f32 %v828_v1, 0.0 }
 0x178   :  { %v834_v3 = vpack.c.bf16 %v833_v2, %v833_v2 }
 0x17a   :  { %1414 = vmatmul.mubr.bf16.vlgmr.msra.gmra.mrb[8].mxu0 %v834_v3 }
 0x17b   :  { %1453 = vmatprep.mubr.msk.bf16.mxu0 %vm1707_vm0, %v1706_v27  ;;  %1438 = vmatpush3.bf16.msra.mxu0 %v1550_v6 }
 0x17c   :  { %1439 = vmatprep.subr.bf16.mxu0 %v1706_v27 }
 0x17f   :  { %1440 = vmatpush3.bf16.msra.mxu0 %v1551_v7 }
 0x180   :  { %1441 = vmatprep.subr.bf16.mxu0 %v1706_v27 }
 0x183   :  { %1442 = vmatpush3.bf16.msra.mxu0 %v1552_v8 }
 0x184   :  { %1443 = vmatprep.subr.bf16.mxu0 %v1706_v27 }
 0x187   :  { %1444 = vmatpush3.bf16.msra.mxu0 %v1553_v9 }
 0x188   :  { %1445 = vmatprep.subr.bf16.mxu0 %v1706_v27 }
 0x18b   :  { %1446 = vmatpush3.bf16.msra.mxu0 %v1554_v10 }
 0x18c   :  { %1447 = vmatprep.subr.bf16.mxu0 %v1706_v27 }
 0x18f   :  { %1448 = vmatpush3.bf16.msra.mxu0 %v1555_v11 }
 0x190   :  { %1449 = vmatprep.subr.bf16.mxu0 %v1706_v27 }
 0x193   :  { %1450 = vmatpush3.bf16.msra.mxu0 %v1556_v20 }
 0x194   :  { %1451 = vmatprep.subr.bf16.mxu0 %v1706_v27 }
 0x197   :  { %1452 = vmatpush3.bf16.msra.mxu0 %v1557_v21 }
 0x24d   :  { %v940_v13 = vpop.f32.mrb[8].mxu0 }
 0x24e   :  { %v941_v14 = vadd.f32 %v1255_v12, %v940_v13  ;;  %v1415_v15 = vpop.f32.mrb[9].mxu0 }
 0x24f   :  { %v943_v16 = vpop.f32.mrb[10].mxu0 }
 0x250   :  { %v946_v17 = vmax.f32 %v941_v14, 0.0  ;;  %v1416_v18 = vpop.f32.mrb[11].mxu0 }
 0x252   :  { %v947_v19 = vpack.c.bf16 %v946_v17, %v946_v17 }
 0x254   :  { %1434 = vmatmul.mubr.bf16.vlgmr.msra.gmra.mrb[8].mxu1 %v947_v19 }
 0x327   :  { %v1053_v23 = vpop.f32.mrb[8].mxu1 }
 0x328   :  { %v1054_v24 = vadd.f32 %v1264_v22, %v1053_v23  ;;  %v1435_v25 = vpop.f32.mrb[9].mxu1 }
 0x329   :  { %v1056_v26 = vpop.f32.mrb[10].mxu1 }
 0x32a   :  { %v1059_v28 = vmax.f32 %v1054_v24, 0.0  ;;  %v1436_v29 = vpop.f32.mrb[11].mxu1 }
 0x32c   :  { %v1060_v30 = vpack.c.bf16 %v1059_v28, %v1059_v28 }
 0x32e   :  { %1454 = vmatmul.mubr.bf16.vlgmr.msra.gmra.mrb[12].mxu0 %v1060_v30 }
 0x401   :  { %v1166_v27 = vpop.f32.mrb[12].mxu0 }
 0x402   :  { %v1167_v32 = vadd.f32 %v1273_v31, %v1166_v27  ;;  %v1455_v33 = vpop.f32.mrb[13].mxu0 }
 0x403   :  { %v1169_v34 = vpop.f32.mrb[14].mxu0 }
 0x404   :  { %1172 = vst [vmem:[#allocation11] sm:$0x3] %v1167_v32  ;;  %v1456_v35 = vpop.f32.mrb[15].mxu0 }
 0x405   :  { %1679 = shalt.err (!%p1676_p2)
}
 0x406   :  { %s1680_s8 = scalar_lea.hbm %s1900_s9, 32 }
 0x407   :  { %p1681_p3 = scmp.ne.s32.totalorder %s1900_s9, %s1680_s8  ;;  %p1684_p4 = scmp.lt.u32.totalorder %s1680_s8, %s1900_s9 }
 0x409   :  { %p1686_p5 = pnand %p1684_p4, %p1681_p3 }
 0x40b   :  { %1689 = shalt.err (!%p1686_p5)
}
 0x40c   :  { %1182 = dma.vmem_to_hbm [thread:$0]  %s1180_s12, 32, %s1900_s9, [#allocation4]  }
 0x40d   :  { %1696 = dma.done.wait [#allocation4], 32  }
 0x40e   :  { %1697 = vsyncadd [#allocation4], 4294967264 }
 0x40f   :  { %1186 = vsyncpa [#allocation3], 1 }
 0x410   :  { %1187 = vsyncpa [#allocation6], 1 }
 0x411   :  { %1188 = vsyncpa [#allocation9], 1 }
 0x412   :  { %1189 = vsyncpa [#allocation4], 1 }

</bundles_post_ra>
